<compile_context>
chip_gen: v5e
topology: v5e:2x2
jax: 0.10.0
libtpu: 0.0.40
codegen_flags: <defaults>
</compile_context>

<pallas_src>
import jax
import jax.numpy as jnp
from jax.experimental import pallas as pl
from jax.experimental.pallas import tpu as pltpu

LEAKY_SLOPE = 0.01
BN_EPS = 1e-5


# ---------------------------------------------------------------------------
# Banded "row-conv" weights: 3x3 conv as 3 matmuls against banded matrices
# ---------------------------------------------------------------------------
def _build_banded_weights(weight_oihw, W):
    """(Cout, Cin, 3, 3) OIHW -> (3, (W+2)*Cin, W*Cout) banded matrices (one per kh).

    bigw[kh, win*Cin+ci, w*Cout+co] = weight[co, ci, kh, win-w] if 0 <= win-w <= 2 else 0
    """
    Cout, Cin, _, _ = weight_oihw.shape
    w_hwio = jnp.transpose(weight_oihw, (2, 3, 1, 0)).astype(jnp.float32)  # (3,3,Cin,Cout)
    win = jnp.arange(W + 2)[:, None]            # padded input column index
    wout = jnp.arange(W)[None, :]               # output column index
    kw = win - wout                             # (W+2, W)
    valid = (kw >= 0) & (kw <= 2)
    kw_c = jnp.clip(kw, 0, 2)
    g = w_hwio[:, kw_c]                         # (3, W+2, W, Cin, Cout)
    g = jnp.where(valid[None, :, :, None, None], g, 0.0)
    g = jnp.transpose(g, (0, 1, 3, 2, 4))       # (3, W+2, Cin, W, Cout)
    return g.reshape(3, (W + 2) * Cin, W * Cout)


def _pick_batch_tile(N, H, max_b=4):
    """Largest batch tile <= max_b dividing N whose row block is 8-aligned.

    max_b is kept small so the three live (B*(H+2), WC) matmul results do not
    blow the 64-vreg budget (review: avoid a huge live f32 accumulator).
    """
    for b in range(min(N, max_b), 0, -1):
        if N % b == 0 and (b == N or (b * (H + 2)) % 8 == 0):
            return b
    return N


# ---------------------------------------------------------------------------
# Wrapper: single fused pallas_call
# ---------------------------------------------------------------------------
def block_forward(x_nchw, weight_oihw, bias, gamma, beta):
    """x_nchw: (N, Cin, H, W) f32 -> (N, Cout, H, W) f32.

    `bias` is accepted (it is a Conv2d parameter) but intentionally unused: under
    training-mode BatchNorm the per-channel conv bias cancels exactly in (x - mean).
    """
    del bias
    N, Cin, H, W = x_nchw.shape
    Cout = weight_oihw.shape[0]
    K = (W + 2) * Cin
    Kp = ((K + 127) // 128) * 128               # pad contraction dim to full lanes
    WC = W * Cout                               # lane-dense output width (128 here)
    B = _pick_batch_tile(N, H)
    steps = N // B
    inv_count = 1.0 / float(N * H * W)

    # Thin XLA glue (fuses into one copy pass): NCHW -> zero-padded, lane-flattened rows.
    # TODO(synk): an NHWC end-to-end model would remove this transpose and the
    # final transpose-back entirely.
    x_nhwc = jnp.transpose(x_nchw, (0, 2, 3, 1)).astype(jnp.float32)
    x_pad = jnp.pad(x_nhwc, ((0, 0), (1, 1), (1, 1), (0, 0)))
    xrows = x_pad.reshape(N, H + 2, K)
    if Kp > K:
        xrows = jnp.pad(xrows, ((0, 0), (0, 0), (0, Kp - K)))
    xrows2d = xrows.reshape(N * (H + 2), Kp)                       # (N*(H+2), Kp)

    bigw = _build_banded_weights(weight_oihw, W)                   # (3, K, WC)
    if Kp > K:
        bigw = jnp.pad(bigw, ((0, 0), (0, Kp - K), (0, 0)))        # (3, Kp, WC)

    gb_rows = jnp.stack([jnp.tile(gamma.astype(jnp.float32), W),
                         jnp.tile(beta.astype(jnp.float32), W)], axis=0)    # (2, WC)

    # Channel-match matrix: M[i, j] = 1 iff lanes i, j belong to the same channel.
    # stat_row @ M = per-channel totals, already broadcast across all W lane groups.
    lane_ch = jnp.arange(WC) % Cout
    chan_mat = (lane_ch[:, None] == lane_ch[None, :]).astype(jnp.float32)   # (WC, WC)

    def kernel(xr_ref, bigw_ref, gb_ref, cm_ref, out_ref, stat_ref):
        # xr_ref  : (B*(H+2), Kp)   padded image rows for this batch tile
        # bigw_ref: (3, Kp, WC)     banded conv weights (resident)
        # gb_ref  : (2, WC)         [gamma tiled; beta tiled]
        # cm_ref  : (WC, WC)        channel-match matrix
        # out_ref : (N*H, WC)       full output, VMEM-resident across the grid
        # stat_ref: (2, WC) VMEM    [per-lane sum; per-lane sum of squares]
        step = pl.program_id(0)

        @pl.when(step == 0)
        def _init():
            stat_ref[...] = jnp.zeros_like(stat_ref)

        # --- conv: 3 banded matmuls over the whole batch tile (M = B*(H+2)) ---
        xr = xr_ref[...]
        y0 = jnp.dot(xr, bigw_ref[0], preferred_element_type=jnp.float32)
        y1 = jnp.dot(xr, bigw_ref[1], preferred_element_type=jnp.float32)
        y2 = jnp.dot(xr, bigw_ref[2], preferred_element_type=jnp.float32)

        ssum = jnp.zeros((1, WC), jnp.float32)
        ssq = jnp.zeros((1, WC), jnp.float32)
        for b in range(B):                        # B is small & static
            base = b * (H + 2)
            conv_b = (y0[base:base + H]
                      + y1[base + 1:base + 1 + H]
                      + y2[base + 2:base + 2 + H])        # (H, WC)
            row0 = (step * B + b) * H
            if H % 8 == 0:
                row0 = pl.multiple_of(row0, 8)
            out_ref[pl.ds(row0, H), :] = conv_b           # resident, un-normalized
            ssum = ssum + jnp.sum(conv_b, axis=0, keepdims=True)
            ssq = ssq + jnp.sum(conv_b * conv_b, axis=0, keepdims=True)

        stat_ref[0:1, :] = stat_ref[0:1, :] + ssum
        stat_ref[1:2, :] = stat_ref[1:2, :] + ssq

        # --- last step: fold BN affine and apply affine + LeakyReLU in place ---
        @pl.when(step == steps - 1)
        def _finalize():
            tot = jnp.dot(stat_ref[...], cm_ref[...],
                          preferred_element_type=jnp.float32)     # (2, WC)
            mean = tot[0:1, :] * inv_count
            var = tot[1:2, :] * inv_count - mean * mean           # biased (BN training)
            inv_std = jax.lax.rsqrt(var + BN_EPS)
            scale = gb_ref[0:1, :] * inv_std
            shift = gb_ref[1:2, :] - mean * scale
            y = out_ref[...] * scale + shift                      # lane-dense, full block
            out_ref[...] = jnp.where(y > 0, y, LEAKY_SLOPE * y)

    # Explicit VMEM budget: double-buffered input tile + resident weights/const +
    # resident output block + stats scratch (generous floor, hard cap).
    est_vmem = (2 * B * (H + 2) * Kp * 4
                + 2 * 3 * Kp * WC * 4
                + 2 * (2 * WC + WC * WC) * 4
                + 2 * N * H * WC * 4
                + 8 * WC * 4)
    vmem_limit = int(min(max(2 * est_vmem, 16 * 1024 * 1024), 100 * 1024 * 1024))

    out2d = pl.pallas_call(
        kernel,
        out_shape=jax.ShapeDtypeStruct((N * H, WC), jnp.float32),
        grid_spec=pltpu.PrefetchScalarGridSpec(
            num_scalar_prefetch=0,
            grid=(steps,),
            in_specs=[pl.BlockSpec((B * (H + 2), Kp), lambda s: (s, 0)),
                      pl.BlockSpec((3, Kp, WC), lambda s: (0, 0, 0)),
                      pl.BlockSpec((2, WC), lambda s: (0, 0)),
                      pl.BlockSpec((WC, WC), lambda s: (0, 0))],
            out_specs=pl.BlockSpec((N * H, WC), lambda s: (0, 0)),
            scratch_shapes=[pltpu.VMEM((2, WC), jnp.float32)]),
        compiler_params=pltpu.CompilerParams(
            dimension_semantics=("arbitrary",),     # sequential batch-stat reduction
            vmem_limit_bytes=vmem_limit),
    )(xrows2d, bigw, gb_rows, chan_mat)

    # Back to NCHW (PyTorch interface).
    return jnp.transpose(out2d.reshape(N, H, W, Cout), (0, 3, 1, 2))


# ---------------------------------------------------------------------------
# Pure-JAX reference (conv + BN training mode + LeakyReLU) for verification
# ---------------------------------------------------------------------------
def _reference_forward(x_nchw, weight_oihw, bias, gamma, beta):
    conv = jax.lax.conv_general_dilated(
        x_nchw, weight_oihw, window_strides=(1, 1), padding="SAME",
        dimension_numbers=("NCHW", "OIHW", "NCHW"))
    conv = conv + bias.reshape(1, -1, 1, 1)
    mean = conv.mean(axis=(0, 2, 3), keepdims=True)
    var = conv.var(axis=(0, 2, 3), keepdims=True)  # biased, matches BN training mode
    y = (conv - mean) / jnp.sqrt(var + BN_EPS)
    y = y * gamma.reshape(1, -1, 1, 1) + beta.reshape(1, -1, 1, 1)
    return jnp.where(y > 0, y, LEAKY_SLOPE * y)


if __name__ == "__main__":
    # Small shapes consistent with Block(in_f=4, out_f=8) on a (2, 4, 16, 16) input.
    N, Cin, Cout, H, W = 2, 4, 8, 16, 16

    key = jax.random.PRNGKey(0)
    kx, kw, kb, kg, kbe = jax.random.split(key, 5)

    x = jax.random.normal(kx, (N, Cin, H, W), dtype=jnp.float32)
    weight = 0.1 * jax.random.normal(kw, (Cout, Cin, 3, 3), dtype=jnp.float32)
    bias = 0.1 * jax.random.normal(kb, (Cout,), dtype=jnp.float32)
    gamma = 1.0 + 0.1 * jax.random.normal(kg, (Cout,), dtype=jnp.float32)
    beta = 0.1 * jax.random.normal(kbe, (Cout,), dtype=jnp.float32)

    out = jax.block_until_ready(block_forward(x, weight, bias, gamma, beta))
    ref = _reference_forward(x, weight, bias, gamma, beta)

    assert out.shape == (N, Cout, H, W)
    assert jnp.allclose(out, ref, rtol=1e-4, atol=1e-4), "mismatch vs reference"

    print("KERNEL_OK")
</pallas_src>

<mosaic_0001>
module attributes {stable_mosaic.version = 11 : i64} {
  func.func @kernel(%arg0: i32, %arg1: memref<36x128xf32, #tpu.memory_space<vmem>>, %arg2: memref<3x128x128xf32, #tpu.memory_space<vmem>>, %arg3: memref<2x128xf32, #tpu.memory_space<vmem>>, %arg4: memref<128x128xf32, #tpu.memory_space<vmem>>, %arg5: memref<32x128xf32, #tpu.memory_space<vmem>>, %arg6: memref<2x128xf32, #tpu.memory_space<vmem>>) attributes {dimension_semantics = [#tpu.dimension_semantics<arbitrary>], iteration_bounds = array<i64: 1>, scalar_prefetch = 0 : i64, scratch_operands = 1 : i64, tpu.core_type = #tpu.core_type<tc>, window_params = [{transform_indices = @transform_0, window_bounds = array<i64: 36, 128>}, {pipeline_mode = #tpu.pipeline_mode<synchronous>, transform_indices = @transform_1, window_bounds = array<i64: 3, 128, 128>}, {pipeline_mode = #tpu.pipeline_mode<synchronous>, transform_indices = @transform_2, window_bounds = array<i64: 2, 128>}, {pipeline_mode = #tpu.pipeline_mode<synchronous>, transform_indices = @transform_3, window_bounds = array<i64: 128, 128>}, {pipeline_mode = #tpu.pipeline_mode<synchronous>, transform_indices = @transform_4, window_bounds = array<i64: 32, 128>}]} {
    %c0_i32 = arith.constant 0 : i32
    %0 = arith.cmpi eq, %arg0, %c0_i32 : i32
    %1 = arith.extui %0 : i1 to i32
    %c0_i32_0 = arith.constant 0 : i32
    %2 = arith.cmpi ne, %1, %c0_i32_0 : i32
    scf.if %2 {
      %cst_32 = arith.constant 0.000000e+00 : f32
      %60 = vector.broadcast %cst_32 : f32 to vector<2x128xf32>
      %c0_33 = arith.constant 0 : index
      %c0_34 = arith.constant 0 : index
      %61 = vector.load %arg6[%c0_33, %c0_34] : memref<2x128xf32, #tpu.memory_space<vmem>>, vector<2x128xf32>
      tpu.vector_store %arg6[%c0_33, %c0_34], %60 {strides = array<i32>} : memref<2x128xf32, #tpu.memory_space<vmem>>, vector<2x128xf32>,
    } else {
    }
    %c0 = arith.constant 0 : index
    %c0_1 = arith.constant 0 : index
    %3 = vector.load %arg1[%c0, %c0_1] : memref<36x128xf32, #tpu.memory_space<vmem>>, vector<36x128xf32>
    %c0_2 = arith.constant 0 : index
    %c0_3 = arith.constant 0 : index
    %c0_4 = arith.constant 0 : index
    %4 = vector.load %arg2[%c0_2, %c0_3, %c0_4] : memref<3x128x128xf32, #tpu.memory_space<vmem>>, vector<1x128x128xf32>
    %5 = vector.shape_cast %4 : vector<1x128x128xf32> to vector<128x128xf32>
    %cst = arith.constant dense<0.000000e+00> : vector<36x128xf32>
    %6 = tpu.matmul %3, %5, %cst {dimension_numbers = #tpu.dot_dimension_numbers<[1], [0], [0], [1], [0, 0, 1, 1], [], []>} : vector<36x128xf32>, vector<128x128xf32>, vector<36x128xf32> -> vector<36x128xf32>
    %c1 = arith.constant 1 : index
    %c0_5 = arith.constant 0 : index
    %c0_6 = arith.constant 0 : index
    %7 = vector.load %arg2[%c1, %c0_5, %c0_6] : memref<3x128x128xf32, #tpu.memory_space<vmem>>, vector<1x128x128xf32>
    %8 = vector.shape_cast %7 : vector<1x128x128xf32> to vector<128x128xf32>
    %cst_7 = arith.constant dense<0.000000e+00> : vector<36x128xf32>
    %9 = tpu.matmul %3, %8, %cst_7 {dimension_numbers = #tpu.dot_dimension_numbers<[1], [0], [0], [1], [0, 0, 1, 1], [], []>} : vector<36x128xf32>, vector<128x128xf32>, vector<36x128xf32> -> vector<36x128xf32>
    %c2 = arith.constant 2 : index
    %c0_8 = arith.constant 0 : index
    %c0_9 = arith.constant 0 : index
    %10 = vector.load %arg2[%c2, %c0_8, %c0_9] : memref<3x128x128xf32, #tpu.memory_space<vmem>>, vector<1x128x128xf32>
    %11 = vector.shape_cast %10 : vector<1x128x128xf32> to vector<128x128xf32>
    %cst_10 = arith.constant dense<0.000000e+00> : vector<36x128xf32>
    %12 = tpu.matmul %3, %11, %cst_10 {dimension_numbers = #tpu.dot_dimension_numbers<[1], [0], [0], [1], [0, 0, 1, 1], [], []>} : vector<36x128xf32>, vector<128x128xf32>, vector<36x128xf32> -> vector<36x128xf32>
    %cst_11 = arith.constant 0.000000e+00 : f32
    %13 = vector.broadcast %cst_11 : f32 to vector<1x128xf32>
    %cst_12 = arith.constant 0.000000e+00 : f32
    %14 = vector.broadcast %cst_12 : f32 to vector<1x128xf32>
    %15 = vector.extract_strided_slice %6 {offsets = [0, 0], sizes = [16, 128], strides = [1, 1]} : vector<36x128xf32> to vector<16x128xf32>
    %16 = vector.extract_strided_slice %9 {offsets = [1, 0], sizes = [16, 128], strides = [1, 1]} : vector<36x128xf32> to vector<16x128xf32>
    %17 = arith.addf %15, %16 : vector<16x128xf32>
    %18 = vector.extract_strided_slice %12 {offsets = [2, 0], sizes = [16, 128], strides = [1, 1]} : vector<36x128xf32> to vector<16x128xf32>
    %19 = arith.addf %17, %18 : vector<16x128xf32>
    %c2_i32 = arith.constant 2 : i32
    %20 = arith.muli %arg0, %c2_i32 : i32
    %c0_i32_13 = arith.constant 0 : i32
    %21 = arith.addi %20, %c0_i32_13 : i32
    %c16_i32 = arith.constant 16 : i32
    %22 = arith.muli %21, %c16_i32 : i32
    %23 = tpu.assume_multiple %22, 8 : i32
    %24 = arith.index_cast %23 : i32 to index
    %c0_14 = arith.constant 0 : index
    %25 = vector.load %arg5[%24, %c0_14] : memref<32x128xf32, #tpu.memory_space<vmem>>, vector<16x128xf32>
    tpu.vector_store %arg5[%24, %c0_14], %19 {strides = array<i32>} : memref<32x128xf32, #tpu.memory_space<vmem>>, vector<16x128xf32>,
    %cst_15 = arith.constant dense<0.000000e+00> : vector<128xf32>
    %26 = vector.multi_reduction <add>, %19, %cst_15 [0] : vector<16x128xf32> to vector<128xf32>
    %27 = vector.shape_cast %26 : vector<128xf32> to vector<1x128xf32>
    %28 = arith.addf %13, %27 : vector<1x128xf32>
    %29 = arith.mulf %19, %19 : vector<16x128xf32>
    %cst_16 = arith.constant dense<0.000000e+00> : vector<128xf32>
    %30 = vector.multi_reduction <add>, %29, %cst_16 [0] : vector<16x128xf32> to vector<128xf32>
    %31 = vector.shape_cast %30 : vector<128xf32> to vector<1x128xf32>
    %32 = arith.addf %14, %31 : vector<1x128xf32>
    %33 = vector.extract_strided_slice %6 {offsets = [18, 0], sizes = [16, 128], strides = [1, 1]} : vector<36x128xf32> to vector<16x128xf32>
    %34 = vector.extract_strided_slice %9 {offsets = [19, 0], sizes = [16, 128], strides = [1, 1]} : vector<36x128xf32> to vector<16x128xf32>
    %35 = arith.addf %33, %34 : vector<16x128xf32>
    %36 = vector.extract_strided_slice %12 {offsets = [20, 0], sizes = [16, 128], strides = [1, 1]} : vector<36x128xf32> to vector<16x128xf32>
    %37 = arith.addf %35, %36 : vector<16x128xf32>
    %c2_i32_17 = arith.constant 2 : i32
    %38 = arith.muli %arg0, %c2_i32_17 : i32
    %c1_i32 = arith.constant 1 : i32
    %39 = arith.addi %38, %c1_i32 : i32
    %c16_i32_18 = arith.constant 16 : i32
    %40 = arith.muli %39, %c16_i32_18 : i32
    %41 = tpu.assume_multiple %40, 8 : i32
    %42 = arith.index_cast %41 : i32 to index
    %c0_19 = arith.constant 0 : index
    %43 = vector.load %arg5[%42, %c0_19] : memref<32x128xf32, #tpu.memory_space<vmem>>, vector<16x128xf32>
    tpu.vector_store %arg5[%42, %c0_19], %37 {strides = array<i32>} : memref<32x128xf32, #tpu.memory_space<vmem>>, vector<16x128xf32>,
    %cst_20 = arith.constant dense<0.000000e+00> : vector<128xf32>
    %44 = vector.multi_reduction <add>, %37, %cst_20 [0] : vector<16x128xf32> to vector<128xf32>
    %45 = vector.shape_cast %44 : vector<128xf32> to vector<1x128xf32>
    %46 = arith.addf %28, %45 : vector<1x128xf32>
    %47 = arith.mulf %37, %37 : vector<16x128xf32>
    %cst_21 = arith.constant dense<0.000000e+00> : vector<128xf32>
    %48 = vector.multi_reduction <add>, %47, %cst_21 [0] : vector<16x128xf32> to vector<128xf32>
    %49 = vector.shape_cast %48 : vector<128xf32> to vector<1x128xf32>
    %50 = arith.addf %32, %49 : vector<1x128xf32>
    %c0_22 = arith.constant 0 : index
    %c0_23 = arith.constant 0 : index
    %51 = vector.load %arg6[%c0_22, %c0_23] : memref<2x128xf32, #tpu.memory_space<vmem>>, vector<1x128xf32>
    %52 = arith.addf %51, %46 : vector<1x128xf32>
    %c0_24 = arith.constant 0 : index
    %c0_25 = arith.constant 0 : index
    %53 = vector.load %arg6[%c0_24, %c0_25] : memref<2x128xf32, #tpu.memory_space<vmem>>, vector<1x128xf32>
    tpu.vector_store %arg6[%c0_24, %c0_25], %52 {strides = array<i32>} : memref<2x128xf32, #tpu.memory_space<vmem>>, vector<1x128xf32>,
    %c1_26 = arith.constant 1 : index
    %c0_27 = arith.constant 0 : index
    %54 = vector.load %arg6[%c1_26, %c0_27] : memref<2x128xf32, #tpu.memory_space<vmem>>, vector<1x128xf32>
    %55 = arith.addf %54, %50 : vector<1x128xf32>
    %c1_28 = arith.constant 1 : index
    %c0_29 = arith.constant 0 : index
    %56 = vector.load %arg6[%c1_28, %c0_29] : memref<2x128xf32, #tpu.memory_space<vmem>>, vector<1x128xf32>
    tpu.vector_store %arg6[%c1_28, %c0_29], %55 {strides = array<i32>} : memref<2x128xf32, #tpu.memory_space<vmem>>, vector<1x128xf32>,
    %c0_i32_30 = arith.constant 0 : i32
    %57 = arith.cmpi eq, %arg0, %c0_i32_30 : i32
    %58 = arith.extui %57 : i1 to i32
    %c0_i32_31 = arith.constant 0 : i32
    %59 = arith.cmpi ne, %58, %c0_i32_31 : i32
    scf.if %59 {
      %c0_32 = arith.constant 0 : index
      %c0_33 = arith.constant 0 : index
      %60 = vector.load %arg6[%c0_32, %c0_33] : memref<2x128xf32, #tpu.memory_space<vmem>>, vector<2x128xf32>
      %c0_34 = arith.constant 0 : index
      %c0_35 = arith.constant 0 : index
      %61 = vector.load %arg4[%c0_34, %c0_35] : memref<128x128xf32, #tpu.memory_space<vmem>>, vector<128x128xf32>
      %cst_36 = arith.constant dense<0.000000e+00> : vector<2x128xf32>
      %62 = tpu.matmul %60, %61, %cst_36 {dimension_numbers = #tpu.dot_dimension_numbers<[1], [0], [0], [1], [0, 0, 1, 1], [], []>} : vector<2x128xf32>, vector<128x128xf32>, vector<2x128xf32> -> vector<2x128xf32>
      %63 = vector.extract_strided_slice %62 {offsets = [0, 0], sizes = [1, 128], strides = [1, 1]} : vector<2x128xf32> to vector<1x128xf32>
      %cst_37 = arith.constant 0.001953125 : f32
      %64 = vector.broadcast %cst_37 : f32 to vector<1x128xf32>
      %65 = arith.mulf %63, %64 : vector<1x128xf32>
      %66 = vector.extract_strided_slice %62 {offsets = [1, 0], sizes = [1, 128], strides = [1, 1]} : vector<2x128xf32> to vector<1x128xf32>
      %cst_38 = arith.constant 0.001953125 : f32
      %67 = vector.broadcast %cst_38 : f32 to vector<1x128xf32>
      %68 = arith.mulf %66, %67 : vector<1x128xf32>
      %69 = arith.mulf %65, %65 : vector<1x128xf32>
      %70 = arith.subf %68, %69 : vector<1x128xf32>
      %cst_39 = arith.constant 9.99999974E-6 : f32
      %71 = vector.broadcast %cst_39 : f32 to vector<1x128xf32>
      %72 = arith.addf %70, %71 : vector<1x128xf32>
      %73 = math.rsqrt %72 : vector<1x128xf32>
      %c0_40 = arith.constant 0 : index
      %c0_41 = arith.constant 0 : index
      %74 = vector.load %arg3[%c0_40, %c0_41] : memref<2x128xf32, #tpu.memory_space<vmem>>, vector<1x128xf32>
      %75 = arith.mulf %74, %73 : vector<1x128xf32>
      %c1_42 = arith.constant 1 : index
      %c0_43 = arith.constant 0 : index
      %76 = vector.load %arg3[%c1_42, %c0_43] : memref<2x128xf32, #tpu.memory_space<vmem>>, vector<1x128xf32>
      %77 = arith.mulf %65, %75 : vector<1x128xf32>
      %78 = arith.subf %76, %77 : vector<1x128xf32>
      %c0_44 = arith.constant 0 : index
      %c0_45 = arith.constant 0 : index
      %79 = vector.load %arg5[%c0_44, %c0_45] : memref<32x128xf32, #tpu.memory_space<vmem>>, vector<32x128xf32>
      %80 = vector.broadcast %75 : vector<1x128xf32> to vector<32x128xf32>
      %81 = arith.mulf %79, %80 : vector<32x128xf32>
      %82 = vector.broadcast %78 : vector<1x128xf32> to vector<32x128xf32>
      %83 = arith.addf %81, %82 : vector<32x128xf32>
      %cst_46 = arith.constant 0.000000e+00 : f32
      %84 = vector.broadcast %cst_46 : f32 to vector<32x128xf32>
      %85 = arith.cmpf ogt, %83, %84 : vector<32x128xf32>
      %cst_47 = arith.constant 0.00999999977 : f32
      %86 = vector.broadcast %cst_47 : f32 to vector<32x128xf32>
      %87 = arith.mulf %86, %83 : vector<32x128xf32>
      %88 = arith.select %85, %83, %87 : vector<32x128xi1>, vector<32x128xf32>
      %c0_48 = arith.constant 0 : index
      %c0_49 = arith.constant 0 : index
      %89 = vector.load %arg5[%c0_48, %c0_49] : memref<32x128xf32, #tpu.memory_space<vmem>>, vector<32x128xf32>
      tpu.vector_store %arg5[%c0_48, %c0_49], %88 {strides = array<i32>} : memref<32x128xf32, #tpu.memory_space<vmem>>, vector<32x128xf32>,
    } else {
    }
    return
  }
  func.func @transform_0(%arg0: i32) -> (i32, i32) {
    %c0_i32 = arith.constant 0 : i32
    %c0_i32_0 = arith.constant 0 : i32
    return %arg0, %c0_i32 : i32, i32
  }
  func.func @transform_1(%arg0: i32) -> (i32, i32, i32) {
    %c0_i32 = arith.constant 0 : i32
    %c0_i32_0 = arith.constant 0 : i32
    %c0_i32_1 = arith.constant 0 : i32
    %c0_i32_2 = arith.constant 0 : i32
    return %c0_i32, %c0_i32_0, %c0_i32_1 : i32, i32, i32
  }
  func.func @transform_2(%arg0: i32) -> (i32, i32) {
    %c0_i32 = arith.constant 0 : i32
    %c0_i32_0 = arith.constant 0 : i32
    %c0_i32_1 = arith.constant 0 : i32
    return %c0_i32, %c0_i32_0 : i32, i32
  }
  func.func @transform_3(%arg0: i32) -> (i32, i32) {
    %c0_i32 = arith.constant 0 : i32
    %c0_i32_0 = arith.constant 0 : i32
    %c0_i32_1 = arith.constant 0 : i32
    return %c0_i32, %c0_i32_0 : i32, i32
  }
  func.func @transform_4(%arg0: i32) -> (i32, i32) {
    %c0_i32 = arith.constant 0 : i32
    %c0_i32_0 = arith.constant 0 : i32
    %c0_i32_1 = arith.constant 0 : i32
    return %c0_i32, %c0_i32_0 : i32, i32
  }
}

</mosaic_0001>

<bundles_post_ra>
// kernel: tpu_custom_call.1
= control target key start
LH: loop header
LB: loop body
LE: loop exit
PB: predicated region body
PF: predicated region fallthrough
CT: control target
= control target key end

     0   :  { %9 = vsyncpa [#allocation4], 0  ;;  %s698_s0 = inlined_call_operand.hbm [shape: f32[36,128], index: 0, kind: input, shape index: {}]   ;;  %s699_s1 = inlined_call_operand.hbm [shape: f32[3,128,128], index: 1, kind: input, shape index: {}]   ;;  %s700_s2 = inlined_call_operand.hbm [shape: f32[2,128], index: 2, kind: input, shape index: {}]   ;;  %s701_s3 = inlined_call_operand.hbm [shape: f32[128,128], index: 3, kind: input, shape index: {}]   ;;  %s702_s4 = inlined_call_operand.hbm [shape: f32[32,128], index: 4, kind: output, shape index: {}]  }
   0x1   :  { %10 = vsyncpa [#allocation7], 0 }
   0x2   :  { %11 = vsyncpa [#allocation10], 0 }
   0x3   :  { %12 = vsyncpa [#allocation5], 0  ;;  %s30_s17 = sshll.u32 %s699_s1, 4  ;;  %s614_s18 = smov [#allocation6]   ;;  %s31_s17 = int_to_ptr.hbm [resolvable:$true] %s30_s17 }
   0x4   :  { %s32_s19 = sshll.u32 %s614_s18, 4  ;;  %s17_s22 = sshll.u32 %s698_s0, 4  ;;  %s33_s19 = int_to_ptr.vmem [resolvable:$true] %s32_s19  ;;  %s18_s22 = int_to_ptr.hbm [resolvable:$true] %s17_s22 }
   0x5   :  { %s615_s23 = smov 128   ;;  %s616_s24 = smov 8  }
   0x6   :  { %38 = dma.hbm_to_vmem [thread:$0]  %s31_s17, 6144, %s33_s19, [#allocation7], %s615_s23, %s615_s23, %s616_s24  }
   0x7   :  { %s617_s25 = smov [#allocation3]   ;;  %s44_s1 = sshll.u32 %s700_s2, 4  ;;  %s45_s1 = int_to_ptr.hbm [resolvable:$true] %s44_s1 }
   0x8   :  { %s19_s26 = sshll.u32 %s617_s25, 4  ;;  %s54_s30 = sshll.u32 %s701_s3, 4  ;;  %s20_s26 = int_to_ptr.vmem [resolvable:$true] %s19_s26  ;;  %s55_s30 = int_to_ptr.hbm [resolvable:$true] %s54_s30 }
   0x9   :  { %25 = dma.hbm_to_vmem [thread:$0]  %s18_s22, 640, %s20_s26, [#allocation4], %s615_s23, %s615_s23, %s616_s24  }
   0xa   :  { %s618_s5 = smov [#allocation8]   ;;  %s619_s7 = smov [#allocation9]  }
   0xb   :  { %s46_s6 = sshll.u32 %s618_s5, 4  ;;  %s56_s8 = sshll.u32 %s619_s7, 4  ;;  %s47_s6 = int_to_ptr.vmem [resolvable:$true] %s46_s6  ;;  %s57_s8 = int_to_ptr.vmem [resolvable:$true] %s56_s8 }
   0xc   :  { %49 = dma.hbm_to_vmem [thread:$0]  %s45_s1, 32, %s47_s6, [#allocation7]  }
   0xd   :  { %62 = dma.hbm_to_vmem [thread:$0]  %s55_s30, 2048, %s57_s8, [#allocation10], %s615_s23, %s615_s23, %s616_s24  }
   0xe   :  { %606 = dma.done.wait [#allocation4], 640  }
   0xf   :  { %607 = vsyncadd [#allocation4], 4294966656 }
  0x10   :  { %608 = dma.done.wait [#allocation7], 6176  }
  0x11   :  { %609 = vsyncadd [#allocation7], 4294961120 }
  0x12   :  { %610 = dma.done.wait [#allocation10], 2048  }
  0x13   :  { %611 = vsyncadd [#allocation10], 4294965248  ;;  %v153_v0 = vld [vmem:[#allocation6 + $0xf8] sm:$0xff]  ;;  %v152_v2 = vld [vmem:[#allocation6 + $0xf0] sm:$0xff]  ;;  %v620_v57 = vmov 0.0   ;;  %vm238_vm0 = vcmask 1046528  }
  0x14   :  { %v202_v1 = vld [vmem:[#allocation6 + $0x178] sm:$0xff]  ;;  %154 = vmatpush.msra.mxu1 %v153_v0  ;;  %v201_v3 = vld [vmem:[#allocation6 + $0x170] sm:$0xff]  ;;  %v151_v4 = vld [vmem:[#allocation6 + $0xe8] sm:$0xff]  ;;  %83 = vst [vmem:[#allocation2] sm:$0x3] %v620_v57  ;;  %vm251_vm1 = vcmask 1045504  }
  0x15   :  { %203 = vmatpush.msra.mxu2 %v202_v1  ;;  %v200_v5 = vld [vmem:[#allocation6 + $0x168] sm:$0xff]  ;;  %v104_v6 = vld [vmem:[#allocation6 + $0x78] sm:$0xff]  ;;  %v103_v7 = vld [vmem:[#allocation6 + $0x70] sm:$0xff]  ;;  %s621_s2 = smov [#allocation11]   ;;  %s460_s11 = sshll.u32 %s702_s4, 4  ;;  %s461_s11 = int_to_ptr.hbm [resolvable:$true] %s460_s11 }
  0x16   :  { %155 = vmatpush.msra.mxu1 %v152_v2  ;;  %105 = vmatpush.msra.mxu0 %v104_v6  ;;  %v150_v8 = vld [vmem:[#allocation6 + $0xe0] sm:$0xff]  ;;  %v102_v10 = vld [vmem:[#allocation6 + $0x68] sm:$0xff]  ;;  %v149_v11 = vld [vmem:[#allocation6 + $0xd8] sm:$0xff]  ;;  %s458_s3 = sshll.u32 %s621_s2, 4  ;;  %s459_s3 = int_to_ptr.vmem [resolvable:$true] %s458_s3 }
  0x17   :  { %204 = vmatpush.msra.mxu2 %v201_v3  ;;  %v199_v9 = vld [vmem:[#allocation6 + $0x160] sm:$0xff]  ;;  %v198_v12 = vld [vmem:[#allocation6 + $0x158] sm:$0xff]  ;;  %v148_v14 = vld [vmem:[#allocation6 + $0xd0] sm:$0xff] }
  0x18   :  { %156 = vmatpush.msra.mxu1 %v151_v4  ;;  %106 = vmatpush.msra.mxu0 %v103_v7  ;;  %v101_v13 = vld [vmem:[#allocation6 + $0x60] sm:$0xff]  ;;  %v197_v15 = vld [vmem:[#allocation6 + $0x150] sm:$0xff]  ;;  %v100_v16 = vld [vmem:[#allocation6 + $0x58] sm:$0xff] }
  0x19   :  { %205 = vmatpush.msra.mxu2 %v200_v5  ;;  %v147_v17 = vld [vmem:[#allocation6 + $0xc8] sm:$0xff]  ;;  %v99_v19 = vld [vmem:[#allocation6 + $0x50] sm:$0xff]  ;;  %v146_v20 = vld [vmem:[#allocation6 + $0xc0] sm:$0xff] }
  0x1a   :  { %157 = vmatpush.msra.mxu1 %v150_v8  ;;  %107 = vmatpush.msra.mxu0 %v102_v10  ;;  %v196_v18 = vld [vmem:[#allocation6 + $0x148] sm:$0xff]  ;;  %v195_v21 = vld [vmem:[#allocation6 + $0x140] sm:$0xff]  ;;  %v145_v23 = vld [vmem:[#allocation6 + $0xb8] sm:$0xff] }
  0x1b   :  { %206 = vmatpush.msra.mxu2 %v199_v9  ;;  %v98_v22 = vld [vmem:[#allocation6 + $0x48] sm:$0xff]  ;;  %v194_v24 = vld [vmem:[#allocation6 + $0x138] sm:$0xff]  ;;  %v97_v25 = vld [vmem:[#allocation6 + $0x40] sm:$0xff] }
  0x1c   :  { %158 = vmatpush.msra.mxu1 %v149_v11  ;;  %108 = vmatpush.msra.mxu0 %v101_v13  ;;  %v144_v26 = vld [vmem:[#allocation6 + $0xb0] sm:$0xff]  ;;  %v96_v28 = vld [vmem:[#allocation6 + $0x38] sm:$0xff]  ;;  %v143_v29 = vld [vmem:[#allocation6 + $0xa8] sm:$0xff] }
  0x1d   :  { %207 = vmatpush.msra.mxu2 %v198_v12  ;;  %v193_v27 = vld [vmem:[#allocation6 + $0x130] sm:$0xff]  ;;  %v192_v30 = vld [vmem:[#allocation6 + $0x128] sm:$0xff]  ;;  %v142_v32 = vld [vmem:[#allocation6 + $0xa0] sm:$0xff] }
  0x1e   :  { %159 = vmatpush.msra.mxu1 %v148_v14  ;;  %109 = vmatpush.msra.mxu0 %v100_v16  ;;  %v95_v31 = vld [vmem:[#allocation6 + $0x30] sm:$0xff]  ;;  %v191_v33 = vld [vmem:[#allocation6 + $0x120] sm:$0xff]  ;;  %v94_v34 = vld [vmem:[#allocation6 + $0x28] sm:$0xff] }
  0x1f   :  { %208 = vmatpush.msra.mxu2 %v197_v15  ;;  %v141_v35 = vld [vmem:[#allocation6 + $0x98] sm:$0xff]  ;;  %v93_v37 = vld [vmem:[#allocation6 + $0x20] sm:$0xff]  ;;  %v140_v38 = vld [vmem:[#allocation6 + $0x90] sm:$0xff] }
  0x20   :  { %160 = vmatpush.msra.mxu1 %v147_v17  ;;  %110 = vmatpush.msra.mxu0 %v99_v19  ;;  %v190_v36 = vld [vmem:[#allocation6 + $0x118] sm:$0xff]  ;;  %v189_v39 = vld [vmem:[#allocation6 + $0x110] sm:$0xff]  ;;  %v139_v41 = vld [vmem:[#allocation6 + $0x88] sm:$0xff] }
  0x21   :  { %209 = vmatpush.msra.mxu2 %v196_v18  ;;  %v92_v40 = vld [vmem:[#allocation6 + $0x18] sm:$0xff]  ;;  %v188_v42 = vld [vmem:[#allocation6 + $0x108] sm:$0xff]  ;;  %v91_v43 = vld [vmem:[#allocation6 + $0x10] sm:$0xff] }
  0x22   :  { %161 = vmatpush.msra.mxu1 %v146_v20  ;;  %111 = vmatpush.msra.mxu0 %v98_v22  ;;  %v138_v44 = vld [vmem:[#allocation6 + $0x80] sm:$0xff]  ;;  %v84_v46 = vld [vmem:[#allocation3] sm:$0xff]  ;;  %v90_v47 = vld [vmem:[#allocation6 + $0x8] sm:$0xff] }
  0x23   :  { %210 = vmatpush.msra.mxu2 %v195_v21  ;;  %v187_v45 = vld [vmem:[#allocation6 + $0x100] sm:$0xff]  ;;  %v86_v50 = vld [vmem:[#allocation3 + $0x10] sm:$0xff]  ;;  %v87_v51 = vld [vmem:[#allocation3 + $0x18] sm:$0xff] }
  0x24   :  { %162 = vmatpush.msra.mxu1 %v145_v23  ;;  %112 = vmatpush.msra.mxu0 %v97_v25  ;;  %v89_v48 = vld [vmem:[#allocation6] sm:$0xff]  ;;  %v88_v52 = vld [vmem:[#allocation3 + $0x20] sm:$0xf]  ;;  %v376_v63 = vld [vmem:[#allocation9 + $0x68] sm:$0xff] }
  0x25   :  { %211 = vmatpush.msra.mxu2 %v194_v24  ;;  %v85_v49 = vld [vmem:[#allocation3 + $0x8] sm:$0xff]  ;;  %v377_v61 = vld [vmem:[#allocation9 + $0x70] sm:$0xff]  ;;  %v372_v12 = vld [vmem:[#allocation9 + $0x48] sm:$0xff] }
  0x26   :  { %163 = vmatpush.msra.mxu1 %v144_v26  ;;  %113 = vmatpush.msra.mxu0 %v96_v28  ;;  %v378_v59 = vld [vmem:[#allocation9 + $0x78] sm:$0xff]  ;;  %v375_v0 = vld [vmem:[#allocation9 + $0x60] sm:$0xff]  ;;  %v373_v6 = vld [vmem:[#allocation9 + $0x50] sm:$0xff] }
  0x27   :  { %212 = vmatpush.msra.mxu2 %v193_v27  ;;  %379 = vmatpush.msra.mxu3 %v378_v59  ;;  %v374_v3 = vld [vmem:[#allocation9 + $0x58] sm:$0xff]  ;;  %v371_v17 = vld [vmem:[#allocation9 + $0x40] sm:$0xff]  ;;  %v369_v26 = vld [vmem:[#allocation9 + $0x30] sm:$0xff] }
  0x28   :  { %164 = vmatpush.msra.mxu1 %v143_v29  ;;  %114 = vmatpush.msra.mxu0 %v95_v31  ;;  %v370_v21 = vld [vmem:[#allocation9 + $0x38] sm:$0xff]  ;;  %v368_v31 = vld [vmem:[#allocation9 + $0x28] sm:$0xff] }
  0x29   :  { %213 = vmatpush.msra.mxu2 %v192_v30  ;;  %380 = vmatpush.msra.mxu3 %v377_v61 }
  0x2a   :  { %165 = vmatpush.msra.mxu1 %v142_v32  ;;  %115 = vmatpush.msra.mxu0 %v94_v34 }
  0x2b   :  { %214 = vmatpush.msra.mxu2 %v191_v33  ;;  %381 = vmatpush.msra.mxu3 %v376_v63 }
  0x2c   :  { %166 = vmatpush.msra.mxu1 %v141_v35  ;;  %116 = vmatpush.msra.mxu0 %v93_v37 }
  0x2d   :  { %215 = vmatpush.msra.mxu2 %v190_v36  ;;  %382 = vmatpush.msra.mxu3 %v375_v0  ;;  %v367_v36 = vld [vmem:[#allocation9 + $0x20] sm:$0xff] }
  0x2e   :  { %167 = vmatpush.msra.mxu1 %v140_v38  ;;  %117 = vmatpush.msra.mxu0 %v92_v40 }
  0x2f   :  { %216 = vmatpush.msra.mxu2 %v189_v39  ;;  %383 = vmatpush.msra.mxu3 %v374_v3  ;;  %v366_v39 = vld [vmem:[#allocation9 + $0x18] sm:$0xff] }
  0x30   :  { %168 = vmatpush.msra.mxu1 %v139_v41  ;;  %118 = vmatpush.msra.mxu0 %v91_v43  ;;  %v365_v41 = vld [vmem:[#allocation9 + $0x10] sm:$0xff] }
  0x31   :  { %217 = vmatpush.msra.mxu2 %v188_v42  ;;  %384 = vmatpush.msra.mxu3 %v373_v6 }
  0x32   :  { %169 = vmatpush.msra.mxu1 %v138_v44  ;;  %119 = vmatpush.msra.mxu0 %v90_v47 }
  0x33   :  { %218 = vmatpush.msra.mxu2 %v187_v45  ;;  %170 = vmatmul.f32.vlgmr.msra.gmra.mxu1 %v84_v46 }
  0x34   :  { %219 = vmatmul.f32.vlgmr.msra.gmra.mxu2 %v84_v46  ;;  %120 = vmatpush.msra.mxu0 %v89_v48 }
  0x35   :  { %121 = vmatmul.f32.vlgmr.msra.gmra.mxu0 %v84_v46  ;;  %385 = vmatpush.msra.mxu3 %v372_v12  ;;  %v364_v46 = vld [vmem:[#allocation9 + $0x8] sm:$0xff] }
  0x37   :  { %386 = vmatpush.msra.mxu3 %v371_v17 }
  0x39   :  { %387 = vmatpush.msra.mxu3 %v370_v21 }
  0x3b   :  { %173 = vmatmul.f32.gmra.mxu1 %v85_v49  ;;  %388 = vmatpush.msra.mxu3 %v369_v26 }
  0x3c   :  { %222 = vmatmul.f32.gmra.mxu2 %v85_v49 }
  0x3d   :  { %124 = vmatmul.f32.gmra.mxu0 %v85_v49  ;;  %389 = vmatpush.msra.mxu3 %v368_v31 }
  0x3f   :  { %390 = vmatpush.msra.mxu3 %v367_v36 }
  0x41   :  { %391 = vmatpush.msra.mxu3 %v366_v39 }
  0x43   :  { %176 = vmatmul.f32.gmra.mxu1 %v86_v50  ;;  %392 = vmatpush.msra.mxu3 %v365_v41 }
  0x44   :  { %225 = vmatmul.f32.gmra.mxu2 %v86_v50 }
  0x45   :  { %127 = vmatmul.f32.gmra.mxu0 %v86_v50  ;;  %v363_v50 = vld [vmem:[#allocation9] sm:$0xff]  ;;  %393 = vmatpush.msra.mxu3 %v364_v46 }
  0x47   :  { %394 = vmatpush.msra.mxu3 %v363_v50  ;;  %v416_v50 = vld [vmem:[#allocation8] sm:$0x1] }
  0x4b   :  { %179 = vmatmul.f32.gmra.mxu1 %v87_v51 }
  0x4c   :  { %228 = vmatmul.f32.gmra.mxu2 %v87_v51 }
  0x4d   :  { %130 = vmatmul.f32.gmra.mxu0 %v87_v51 }
  0x53   :  { %182 = vmatmul.f32.gmra.mxu1 %v88_v52 }
  0x54   :  { %231 = vmatmul.f32.gmra.mxu2 %v88_v52 }
  0x55   :  { %133 = vmatmul.f32.gmra.mxu0 %v88_v52 }
  0xb0   :  { %v171_v53 = vpop.f32.mrf.mxu1 }
  0xb1   :  { %v239_v8 = vrot.slane %v171_v53, 1 }
  0xb2   :  { %v122_v54 = vpop.f32.mrf.mxu0 }
  0xb7   :  { %v220_v55 = vpop.f32.mrf.mxu2 }
  0xb8   :  { %v174_v56 = vpop.f32.mrf.mxu1  ;;  %v252_v14 = vrot.slane %v220_v55, 2 }
  0xb9   :  { %v240_v4 = vrot.slane %v174_v56, 1 }
  0xba   :  { %v125_v58 = vpop.f32.mrf.mxu0 }
  0xbb   :  { %v241_v15 = vsel %vm238_vm0, %v239_v8, %v240_v4 }
  0xbc   :  { %v246_v22 = vadd.f32 %v241_v15, %v122_v54 }
  0xbf   :  { %v223_v60 = vpop.f32.mrf.mxu2 }
  0xc0   :  { %v177_v62 = vpop.f32.mrf.mxu1  ;;  %v253_v9 = vrot.slane %v223_v60, 2 }
  0xc1   :  { %v242_v1 = vrot.slane %v177_v62, 1 }
  0xc2   :  { %v128_v2 = vpop.f32.mrf.mxu0  ;;  %v254_v19 = vsel %vm251_vm1, %v252_v14, %v253_v9 }
  0xc3   :  { %v243_v10 = vsel %vm238_vm0, %v240_v4, %v242_v1  ;;  %v675_v27 = vadd.f32 %v254_v19, %v246_v22 }
  0xc4   :  { %v247_v18 = vadd.f32 %v243_v10, %v125_v58 }
  0xc5   :  { %v273_v37 = vmul.f32 %v675_v27, %v675_v27 }
  0xc7   :  { %v226_v5 = vpop.f32.mrf.mxu2 }
  0xc8   :  { %v255_v7 = vrot.slane %v226_v5, 2  ;;  %v180_v11 = vpop.f32.mrf.mxu1 }
  0xc9   :  { %v285_v13 = vrot.slane %v180_v11, 1 }
  0xca   :  { %v256_v16 = vsel %vm251_vm1, %v253_v9, %v255_v7  ;;  %v131_v20 = vpop.f32.mrf.mxu0 }
  0xcb   :  { %v672_v23 = vadd.f32 %v256_v16, %v247_v18  ;;  %v286_v24 = vsel %vm238_vm0, %v242_v1, %v285_v13 }
  0xcc   :  { %v292_v29 = vadd.f32 %v286_v24, %v128_v2 }
  0xcd   :  { %v274_v32 = vmul.f32 %v672_v23, %v672_v23  ;;  %v265_v38 = vadd.f32 %v672_v23, %v675_v27 }
  0xcf   :  { %v229_v25 = vpop.f32.mrf.mxu2  ;;  %v275_v42 = vadd.f32 %v274_v32, %v273_v37  ;;  %v266_v47 = vrot.slane %v265_v38, 4  ;;  %v356_v32 = vld [vmem:[#allocation2 + $0x1] sm:$0x1] }
  0xd0   :  { %v297_v28 = vrot.slane %v229_v25, 2  ;;  %v183_v30 = vpop.f32.mrf.mxu1 }
  0xd1   :  { %v287_v34 = vrot.slane %v183_v30, 1  ;;  %v276_v51 = vrot.slane %v275_v42, 4  ;;  %v267_v56 = vadd.f32 %v266_v47, %v265_v38 }
  0xd2   :  { %v298_v33 = vsel %vm251_vm1, %v255_v7, %v297_v28  ;;  %v134_v40 = vpop.f32.mrf.mxu0 }
  0xd3   :  { %v304_v35 = vadd.f32 %v298_v33, %v292_v29  ;;  %v288_v43 = vsel %vm238_vm0, %v285_v13, %v287_v34  ;;  %v294_v44 = vadd.f32 %v287_v34, %v134_v40  ;;  %v277_v62 = vadd.f32 %v276_v51, %v275_v42 }
  0xd4   :  { %v293_v49 = vadd.f32 %v288_v43, %v131_v20  ;;  %v268_v4 = vrot.slane %v267_v56, 2 }
  0xd5   :  { %311 = vst [vmem:[#allocation11 + $0xe] sm:$0xfc] %v304_v35  ;;  %v332_v54 = vmul.f32 %v304_v35, %v304_v35  ;;  %v317_v59 = vrot.slane %v304_v35, 2  ;;  %v278_v8 = vrot.slane %v277_v62, 2 }
  0xd6   :  { %v269_v11 = vadd.f32 %v268_v4, %v267_v56 }
  0xd7   :  { %v232_v45 = vpop.f32.mrf.mxu2  ;;  %v338_v0 = vrot.slane %v332_v54, 2  ;;  %v279_v14 = vadd.f32 %v278_v8, %v277_v62 }
  0xd8   :  { %v299_v48 = vrot.slane %v232_v45, 2  ;;  %v270_v17 = vrot.slane %v269_v11, 1 }
  0xd9   :  { %v280_v20 = vrot.slane %v279_v14, 1 }
  0xda   :  { %v300_v52 = vsel %vm251_vm1, %v297_v28, %v299_v48  ;;  %v306_v53 = vadd.f32 %v299_v48, %v294_v44  ;;  %v271_v24 = vadd.f32 %v270_v17, %v269_v11  ;;  %v353_v28 = vld [vmem:[#allocation2] sm:$0x1] }
  0xdb   :  { %v305_v55 = vadd.f32 %v300_v52, %v293_v49  ;;  %v281_v29 = vadd.f32 %v280_v20, %v279_v14 }
  0xdc   :  { %313 = vst [vmem:[#allocation11 + $0x1e] sm:$0x3] %v306_v53  ;;  %v320_v57 = vrot.slane %v306_v53, 2  ;;  %v334_v58 = vmul.f32 %v306_v53, %v306_v53  ;;  %v421_v53 = vld [vmem:[#allocation8 + $0x1] sm:$0x1] }
  0xdd   :  { %312 = vst [vmem:[#allocation11 + $0x16] sm:$0xff] %v305_v55  ;;  %v318_v60 = vrot.slane %v305_v55, 2  ;;  %v333_v61 = vmul.f32 %v305_v55, %v305_v55 }
  0xde   :  { %v341_v63 = vrot.slane %v334_v58, 2 }
  0xdf   :  { %v319_v1 = vsel %vm251_vm1, %v317_v59, %v318_v60  ;;  %v321_v2 = vsel %vm251_vm1, %v318_v60, %v320_v57  ;;  %v339_v3 = vrot.slane %v333_v61, 2 }
  0xe0   :  { %v324_v5 = vadd.f32 %v321_v2, %v319_v1 }
  0xe1   :  { %v340_v6 = vsel %vm251_vm1, %v338_v0, %v339_v3  ;;  %v342_v7 = vsel %vm251_vm1, %v339_v3, %v341_v63 }
  0xe2   :  { %v325_v9 = vrot.slane %v324_v5, 4  ;;  %v345_v10 = vadd.f32 %v342_v7, %v340_v6 }
  0xe4   :  { %v326_v12 = vadd.f32 %v325_v9, %v324_v5  ;;  %v346_v13 = vrot.slane %v345_v10, 4  ;;  %v426_v57 = vld [vmem:[#allocation11 + $0x10] sm:$0xff]  ;;  %v427_v58 = vld [vmem:[#allocation11 + $0x18] sm:$0xff] }
  0xe6   :  { %v327_v15 = vrot.slane %v326_v12, 2  ;;  %v347_v16 = vadd.f32 %v346_v13, %v345_v10 }
  0xe8   :  { %v328_v18 = vadd.f32 %v327_v15, %v326_v12  ;;  %v348_v19 = vrot.slane %v347_v16, 2 }
  0xea   :  { %v329_v21 = vrot.slane %v328_v18, 1  ;;  %v349_v22 = vadd.f32 %v348_v19, %v347_v16 }
  0xec   :  { %v330_v25 = vadd.f32 %v329_v21, %v328_v18  ;;  %v350_v26 = vrot.slane %v349_v22, 1 }
  0xee   :  { %v331_v30 = vadd.f32 %v330_v25, %v271_v24  ;;  %v351_v31 = vadd.f32 %v350_v26, %v349_v22 }
  0xf0   :  { %v352_v33 = vadd.f32 %v351_v31, %v281_v29  ;;  %v354_v34 = vadd.f32 %v353_v28, %v331_v30 }
  0xf2   :  { %355 = vst [vmem:[#allocation2] sm:$0x1] %v354_v34  ;;  %v357_v35 = vadd.f32 %v356_v32, %v352_v33 }
  0xf4   :  { %358 = vst [vmem:[#allocation2 + $0x1] sm:$0x1] %v357_v35 }
  0xfb   :  { %v362_v36 = vld [vmem:[#allocation2] sm:$0x3] }
  0xfc   :  { %395 = vmatmul.f32.vlgmr.msra.gmra.mxu3 %v362_v36 }
 0x17f   :  { %v396_v37 = vpop.f32.mrf.mxu3 }
 0x180   :  { %v399_v38 = vmul.f32 0.001953125, %v396_v37 }
 0x182   :  { %v400_v39 = vmul.f32 %v399_v38, %v399_v38 }
 0x184   :  { %v402_v40 = vrot.slane %v400_v39, 7 }
 0x186   :  { %v404_v41 = vsub.f32 %v399_v38, %v402_v40 }
 0x188   :  { %v405_v42 = vadd.f32 1e-05, %v404_v41 }
 0x18a   :  { %484 = vrsqrt.f32 %v405_v42  ;;  %vm412_vm3 = vweird.f32 %v405_v42 }
 0x190   :  { %v485_v43 = vpop.eup %484 }
 0x191   :  { %v407_v44 = vmul.f32 %v485_v43, %v405_v42  ;;  %vm413_vm2 = vweird.f32 %v485_v43 }
 0x192   :  { %vm414_vm4 = vmor %vm412_vm3, %vm413_vm2 }
 0x193   :  { %v408_v45 = vmul.f32 %v485_v43, %v407_v44 }
 0x195   :  { %v409_v46 = vmul.f32 0.5, %v408_v45 }
 0x197   :  { %v410_v47 = vsub.f32 1.5, %v409_v46 }
 0x199   :  { %v411_v48 = vmul.f32 %v485_v43, %v410_v47 }
 0x19b   :  { %v415_v49 = vsel %vm414_vm4, %v485_v43, %v411_v48 }
 0x19c   :  { %v418_v51 = vrot.slane %v415_v49, 1 }
 0x19e   :  { %v420_v52 = vmul.f32 %v418_v51, %v416_v50 }
 0x1a0   :  { %v422_v54 = vmul.f32 %v420_v52, %v399_v38  ;;  %v428_v55 = vperm.slane %v420_v52, 0 }
 0x1a2   :  { %v423_v56 = vsub.f32 %v421_v53, %v422_v54  ;;  %v429_v59 = vmul.f32 %v428_v55, %v675_v27  ;;  %v430_v60 = vmul.f32 %v428_v55, %v672_v23  ;;  %v431_v61 = vmul.f32 %v428_v55, %v426_v57 }
 0x1a3   :  { %v432_v62 = vmul.f32 %v428_v55, %v427_v58 }
 0x1a4   :  { %v433_v63 = vperm.slane %v423_v56, 0 }
 0x1a6   :  { %v434_v0 = vadd.f32 %v433_v63, %v429_v59  ;;  %v435_v1 = vadd.f32 %v433_v63, %v430_v60  ;;  %v436_v2 = vadd.f32 %v433_v63, %v431_v61  ;;  %v437_v3 = vadd.f32 %v433_v63, %v432_v62 }
 0x1a8   :  { %vm440_vm5 = vcmp.gt.f32.partialorder %v436_v2, 0.0  ;;  %vm441_vm6 = vcmp.gt.f32.partialorder %v437_v3, 0.0  ;;  %v442_v4 = vmul.f32 0.01, %v434_v0  ;;  %v443_v5 = vmul.f32 0.01, %v435_v1 }
 0x1a9   :  { %v444_v27 = vmul.f32 0.01, %v436_v2  ;;  %v445_v6 = vmul.f32 0.01, %v437_v3  ;;  %vm438_vm7 = vcmp.gt.f32.partialorder %v434_v0, 0.0  ;;  %vm439_vm8 = vcmp.gt.f32.partialorder %v435_v1, 0.0 }
 0x1aa   :  { %v446_v23 = vsel %vm438_vm7, %v434_v0, %v442_v4  ;;  %v447_v7 = vsel %vm439_vm8, %v435_v1, %v443_v5 }
 0x1ab   :  { %v448_v8 = vsel %vm440_vm5, %v436_v2, %v444_v27  ;;  %v449_v9 = vsel %vm441_vm6, %v437_v3, %v445_v6  ;;  %450 = vst [vmem:[#allocation11] sm:$0xff] %v446_v23 }
 0x1ac   :  { %451 = vst [vmem:[#allocation11 + $0x8] sm:$0xff] %v447_v7 }
 0x1ad   :  { %452 = vst [vmem:[#allocation11 + $0x10] sm:$0xff] %v448_v8 }
 0x1ae   :  { %453 = vst [vmem:[#allocation11 + $0x18] sm:$0xff] %v449_v9 }
 0x1af   :  { %466 = dma.vmem_to_hbm [thread:$0]  %s459_s3, 512, %s461_s11, [#allocation5], %s615_s23, %s615_s23, %s616_s24  }
 0x1b0   :  { %612 = dma.done.wait [#allocation5], 512  }
 0x1b1   :  { %613 = vsyncadd [#allocation5], 4294966784 }
 0x1b2   :  { %471 = vsyncpa [#allocation4], 1 }
 0x1b3   :  { %472 = vsyncpa [#allocation7], 1 }
 0x1b4   :  { %473 = vsyncpa [#allocation10], 1 }
 0x1b5   :  { %474 = vsyncpa [#allocation5], 1 }

</bundles_post_ra>
